<compile_context>
chip_gen: v5e
topology: v5e:2x2
jax: 0.10.0
libtpu: 0.0.40
codegen_flags: <defaults>
</compile_context>

<pallas_src>
import functools

import jax
import jax.numpy as jnp
from jax.experimental import pallas as pl
from jax.experimental.pallas import tpu as pltpu

EPS = 1e-12  # torch F.normalize default

SUB_ROWS = 256                          # caps in-kernel f32 temps at ~3*256*dim*4 B
TARGET_STEPS = 8                        # megacore: prefer several equal steps
MAX_TILE_BYTES = 4 * 1024 * 1024        # per input tile; roofline flat above ~1 MiB
MIN_SPLIT_TILE_BYTES = 1 * 1024 * 1024  # don't split steps below the ~85%-roofline point


def _rmsnorm_kernel(x_ref, gamma_ref, o_ref, *, scale, sub_rows):
    # x_ref / o_ref: (row_tile, dim) blocks in VMEM; gamma_ref: (1, dim).
    # Fold the static sqrt(dim) scale and the "+1" into gamma once per tile.
    g = (gamma_ref[...].astype(jnp.float32) + 1.0) * scale            # (1, dim)
    n_chunks = x_ref.shape[0] // sub_rows                             # static

    def process(i):
        xb = x_ref[pl.ds(i, sub_rows), :].astype(jnp.float32)         # bounded f32 temp
        sq = jnp.sum(xb * xb, axis=-1, keepdims=True)                 # (sub, 1)
        # x / max(||x||, EPS) == x * rsqrt(max(||x||^2, EPS^2))   (sqrt monotone)
        inv = jax.lax.rsqrt(jnp.maximum(sq, EPS * EPS))               # EUP slot
        o_ref[pl.ds(i, sub_rows), :] = (xb * inv * g).astype(o_ref.dtype)

    if n_chunks == 1:
        process(0)
    else:
        def body(c, carry):
            process(pl.multiple_of(c * sub_rows, sub_rows))
            return carry
        jax.lax.fori_loop(0, n_chunks, body, 0, unroll=True)


def _round_up(x, m):
    return ((x + m - 1) // m) * m


def _sublane_align(dtype):
    # sublane packing: 8 rows for 4-byte, 16 for 2-byte, 32 for 1-byte dtypes
    itemsize = jnp.dtype(dtype).itemsize
    return max(8, 32 // max(1, itemsize))


def _default_vmem_limit():
    try:
        cap = int(pltpu.get_tpu_info().vmem_capacity_bytes)
    except Exception:
        cap = 64 * 1024 * 1024  # conservative fallback: v7x per-TC physical VMEM
    # ~50% of physical: 32 MiB on v7x (64 MiB/TC), 64 MiB on v5e/v6e (128 MiB).
    return max(32 * 1024 * 1024, min(cap // 2, 96 * 1024 * 1024))


def _pick_tiling(rows, dim_p, dtype, vmem_limit_bytes):
    align = _sublane_align(dtype)
    itemsize = jnp.dtype(dtype).itemsize
    rows_aligned = _round_up(rows, align)
    row_bytes = dim_p * itemsize

    # VMEM model per grid step: 2x double-buffered input + output tiles, plus
    # the *bounded* f32 chunk temps (upcast x + products) and gamma, 15% slack.
    temp_bytes = 3 * min(SUB_ROWS, rows_aligned) * dim_p * 4 + 4 * dim_p * 4
    io_budget = max(4 * align * row_bytes,
                    int(vmem_limit_bytes * 0.85) - temp_bytes)
    max_tile = min(io_budget // (4 * row_bytes), MAX_TILE_BYTES // row_bytes)
    max_tile = max(align, (max_tile // align) * align)
    max_tile = min(max_tile, rows_aligned)

    # Equal-sized grid steps (no near-empty ragged trailer).  For megacore,
    # prefer up to TARGET_STEPS of them as long as each step still moves
    # >= MIN_SPLIT_TILE_BYTES of input (stays at the ~85%-roofline point).
    min_split_rows = _round_up(
        max(align, pl.cdiv(MIN_SPLIT_TILE_BYTES, row_bytes)), align)
    max_useful_steps = max(1, rows // min_split_rows)
    n_steps = max(pl.cdiv(rows, max_tile), min(TARGET_STEPS, max_useful_steps))

    row_tile = _round_up(pl.cdiv(rows, n_steps), align)
    # Split the tile into equal, aligned, <= SUB_ROWS sub-chunks for the f32 math.
    n_chunks = pl.cdiv(row_tile, SUB_ROWS)
    sub_rows = _round_up(pl.cdiv(row_tile, n_chunks), align)
    row_tile = sub_rows * n_chunks
    return row_tile, sub_rows


def rmsnorm(x, gamma, *, row_tile=None, vmem_limit_bytes=None):
    """x: (..., dim), gamma: (dim,). Returns same shape/dtype as x."""
    dim = x.shape[-1]
    scale = float(dim) ** 0.5
    orig_shape = x.shape
    x2 = x.reshape(-1, dim)
    rows = x2.shape[0]
    gamma2 = gamma.reshape(1, dim)

    # Lane-dense output: pad the feature dim to a multiple of 128 so stores are
    # full-lane vst (not masked vst.msk).  Zero padding leaves the L2 norm and
    # the valid output lanes unchanged; padded lanes are sliced off afterwards.
    dim_p = _round_up(dim, 128)
    if dim_p != dim:
        x2 = jnp.pad(x2, ((0, 0), (0, dim_p - dim)))
        gamma2 = jnp.pad(gamma2, ((0, 0), (0, dim_p - dim)))

    if vmem_limit_bytes is None:
        vmem_limit_bytes = _default_vmem_limit()

    align = _sublane_align(x.dtype)
    if row_tile is None:
        row_tile, sub_rows = _pick_tiling(rows, dim_p, x.dtype, vmem_limit_bytes)
    else:
        assert row_tile % align == 0, "row_tile must match the dtype's sublane packing"
        sub_rows = row_tile

    itemsize = jnp.dtype(x.dtype).itemsize
    cost = pl.CostEstimate(
        flops=4 * rows * dim_p,                                   # sq, sum, *inv, *g
        transcendentals=rows,                                     # one rsqrt per row
        bytes_accessed=2 * rows * dim_p * itemsize + dim_p * itemsize,
    )

    grid = (pl.cdiv(rows, row_tile),)

    out = pl.pallas_call(
        functools.partial(_rmsnorm_kernel, scale=scale, sub_rows=sub_rows),
        out_shape=jax.ShapeDtypeStruct((rows, dim_p), x.dtype),
        grid_spec=pltpu.PrefetchScalarGridSpec(
            num_scalar_prefetch=0,
            grid=grid,
            in_specs=[
                pl.BlockSpec((row_tile, dim_p), lambda i: (i, 0)),
                pl.BlockSpec((1, dim_p), lambda i: (0, 0)),
            ],
            out_specs=pl.BlockSpec((row_tile, dim_p), lambda i: (i, 0)),
        ),
        compiler_params=pltpu.CompilerParams(
            dimension_semantics=("parallel",),
            vmem_limit_bytes=vmem_limit_bytes,
        ),
        cost_estimate=cost,
    )(x2, gamma2)

    if dim_p != dim:
        out = out[:, :dim]
    return out.reshape(orig_shape)


def rmsnorm_ref(x, gamma):
    dim = x.shape[-1]
    scale = float(dim) ** 0.5
    xf = x.astype(jnp.float32)
    norm = jnp.sqrt(jnp.sum(xf * xf, axis=-1, keepdims=True))
    return (xf / jnp.maximum(norm, EPS)) * scale * (gamma.astype(jnp.float32) + 1.0)


if __name__ == "__main__":
    key = jax.random.PRNGKey(0)
    batch, seq, hidden = 2, 8, 32
    kx, kg = jax.random.split(key)
    x = jax.random.normal(kx, (batch, seq, hidden), dtype=jnp.float32)
    # nn.Parameter(torch.zeros(dim)) -- zeros init, perturbed slightly to
    # exercise the (gamma + 1) path.
    gamma = jnp.zeros((hidden,), dtype=jnp.float32) + 0.01 * jax.random.normal(
        kg, (hidden,), dtype=jnp.float32
    )

    out = rmsnorm(x, gamma)
    out = jax.block_until_ready(out)

    ref = rmsnorm_ref(x, gamma)
    assert out.shape == x.shape
    assert jnp.allclose(out, ref, atol=1e-5, rtol=1e-5), "mismatch vs reference"
    print("KERNEL_OK")
</pallas_src>

<mosaic_0001>
module attributes {stable_mosaic.version = 11 : i64} {
  func.func @_rmsnorm_kernel(%arg0: i32, %arg1: memref<16x128xf32, #tpu.memory_space<vmem>>, %arg2: memref<1x128xf32, #tpu.memory_space<vmem>>, %arg3: memref<16x128xf32, #tpu.memory_space<vmem>>) attributes {dimension_semantics = [#tpu.dimension_semantics<parallel>], iteration_bounds = array<i64: 1>, scalar_prefetch = 0 : i64, scratch_operands = 0 : i64, tpu.core_type = #tpu.core_type<tc>, window_params = [{transform_indices = @transform_0, window_bounds = array<i64: 16, 128>}, {pipeline_mode = #tpu.pipeline_mode<synchronous>, transform_indices = @transform_1, window_bounds = array<i64: 1, 128>}, {transform_indices = @transform_2, window_bounds = array<i64: 16, 128>}]} {
    %c0 = arith.constant 0 : index
    %c0_0 = arith.constant 0 : index
    %0 = vector.load %arg2[%c0, %c0_0] : memref<1x128xf32, #tpu.memory_space<vmem>>, vector<1x128xf32>
    %cst = arith.constant 1.000000e+00 : f32
    %1 = vector.broadcast %cst : f32 to vector<1x128xf32>
    %2 = arith.addf %0, %1 : vector<1x128xf32>
    %cst_1 = arith.constant 5.65685415 : f32
    %3 = vector.broadcast %cst_1 : f32 to vector<1x128xf32>
    %4 = arith.mulf %2, %3 : vector<1x128xf32>
    %c0_2 = arith.constant 0 : index
    %c0_3 = arith.constant 0 : index
    %5 = vector.load %arg1[%c0_2, %c0_3] : memref<16x128xf32, #tpu.memory_space<vmem>>, vector<16x128xf32>
    %6 = arith.mulf %5, %5 : vector<16x128xf32>
    %cst_4 = arith.constant dense<0.000000e+00> : vector<16xf32>
    %7 = vector.multi_reduction <add>, %6, %cst_4 [1] : vector<16x128xf32> to vector<16xf32>
    %8 = vector.shape_cast %7 : vector<16xf32> to vector<16x1xf32>
    %cst_5 = arith.constant 1.000000e-24 : f32
    %9 = vector.broadcast %cst_5 : f32 to vector<16x1xf32>
    %10 = arith.maximumf %8, %9 : vector<16x1xf32>
    %11 = math.rsqrt %10 : vector<16x1xf32>
    %12 = vector.broadcast %11 : vector<16x1xf32> to vector<16x128xf32>
    %13 = arith.mulf %5, %12 : vector<16x128xf32>
    %14 = vector.broadcast %4 : vector<1x128xf32> to vector<16x128xf32>
    %15 = arith.mulf %13, %14 : vector<16x128xf32>
    %c0_6 = arith.constant 0 : index
    %c0_7 = arith.constant 0 : index
    %16 = vector.load %arg3[%c0_6, %c0_7] : memref<16x128xf32, #tpu.memory_space<vmem>>, vector<16x128xf32>
    tpu.vector_store %arg3[%c0_6, %c0_7], %15 {strides = array<i32>} : memref<16x128xf32, #tpu.memory_space<vmem>>, vector<16x128xf32>,
    return
  }
  func.func @transform_0(%arg0: i32) -> (i32, i32) {
    %c0_i32 = arith.constant 0 : i32
    %c0_i32_0 = arith.constant 0 : i32
    return %arg0, %c0_i32 : i32, i32
  }
  func.func @transform_1(%arg0: i32) -> (i32, i32) {
    %c0_i32 = arith.constant 0 : i32
    %c0_i32_0 = arith.constant 0 : i32
    %c0_i32_1 = arith.constant 0 : i32
    return %c0_i32, %c0_i32_0 : i32, i32
  }
  func.func @transform_2(%arg0: i32) -> (i32, i32) {
    %c0_i32 = arith.constant 0 : i32
    %c0_i32_0 = arith.constant 0 : i32
    return %arg0, %c0_i32 : i32, i32
  }
}

</mosaic_0001>

<bundles_post_ra>
// kernel: tpu_custom_call.1
= control target key start
LH: loop header
LB: loop body
LE: loop exit
PB: predicated region body
PF: predicated region fallthrough
CT: control target
= control target key end

     0   :  { %7 = vsyncpa [#allocation3], 0  ;;  %s226_s0 = inlined_call_operand.hbm [shape: f32[16,128], index: 0, kind: input, shape index: {}]   ;;  %s227_s1 = inlined_call_operand.hbm [shape: f32[1,128], index: 1, kind: input, shape index: {}]   ;;  %s228_s2 = inlined_call_operand.hbm [shape: f32[16,128], index: 2, kind: output, shape index: {}]  }
   0x1   :  { %8 = vsyncpa [#allocation6], 0 }
   0x2   :  { %9 = vsyncpa [#allocation4], 0  ;;  %s14_s11 = sshll.u32 %s226_s0, 4  ;;  %s191_s12 = smov [#allocation2]   ;;  %s15_s11 = int_to_ptr.hbm [resolvable:$true] %s14_s11 }
   0x3   :  { %s16_s13 = sshll.u32 %s191_s12, 4  ;;  %s28_s16 = sshll.u32 %s227_s1, 4  ;;  %s17_s13 = int_to_ptr.vmem [resolvable:$true] %s16_s13  ;;  %s29_s16 = int_to_ptr.hbm [resolvable:$true] %s28_s16 }
   0x4   :  { %s192_s17 = smov 128   ;;  %s193_s18 = smov 8  }
   0x5   :  { %22 = dma.hbm_to_vmem [thread:$0]  %s15_s11, 256, %s17_s13, [#allocation3], %s192_s17, %s192_s17, %s193_s18  }
   0x6   :  { %s194_s19 = smov [#allocation5]  }
   0x7   :  { %s30_s20 = sshll.u32 %s194_s19, 4  ;;  %s31_s20 = int_to_ptr.vmem [resolvable:$true] %s30_s20 }
   0x8   :  { %33 = dma.hbm_to_vmem [thread:$0]  %s29_s16, 16, %s31_s20, [#allocation6]  }
   0x9   :  { %185 = dma.done.wait [#allocation3], 256  }
   0xa   :  { %186 = vsyncadd [#allocation3], 4294967040 }
   0xb   :  { %187 = dma.done.wait [#allocation6], 16  }
   0xc   :  { %188 = vsyncadd [#allocation6], 4294967280  ;;  %v45_v0 = vld [vmem:[#allocation2] sm:$0xff]  ;;  %v46_v2 = vld [vmem:[#allocation2 + $0x8] sm:$0xff]  ;;  %s195_s0 = smov [#allocation7]   ;;  %s90_s23 = sshll.u32 %s228_s2, 4  ;;  %s91_s23 = int_to_ptr.hbm [resolvable:$true] %s90_s23 }
   0xd   :  { %v47_v1 = vmul.f32 %v45_v0, %v45_v0  ;;  %v48_v3 = vmul.f32 %v46_v2, %v46_v2  ;;  %v42_v7 = vld [vmem:[#allocation5] sm:$0x1]  ;;  %s88_s1 = sshll.u32 %s195_s0, 4  ;;  %s89_s1 = int_to_ptr.vmem [resolvable:$true] %s88_s1 }
   0xe   :  { %v43_v11 = vadd.f32 1.0, %v42_v7 }
   0xf   :  { %49 = vadd.xlane.f32.xlu0 %v47_v1 }
  0x10   :  { %v44_v14 = vmul.f32 5.656854, %v43_v11 }
  0x12   :  { %v78_v19 = vperm.slane %v44_v14, 0 }
  0x17   :  { %51 = vadd.xlane.f32.xlu0 %v48_v3 }
  0x82   :  { %v50_v4 = vpop.xlane.xlu0 %49 }
  0x83   :  { %v53_v5 = vmax.f32 %v50_v4, 1e-24 }
  0x85   :  { %109 = vrsqrt.f32 %v53_v5  ;;  %vm61_vm1 = vweird.f32 %v53_v5 }
  0x8a   :  { %v52_v6 = vpop.xlane.xlu0 %51 }
  0x8b   :  { %v110_v8 = vpop.eup %109  ;;  %v54_v9 = vmax.f32 %v52_v6, 1e-24 }
  0x8c   :  { %v56_v10 = vmul.f32 %v110_v8, %v53_v5  ;;  %vm62_vm0 = vweird.f32 %v110_v8 }
  0x8d   :  { %111 = vrsqrt.f32 %v54_v9  ;;  %vm63_vm2 = vmor %vm61_vm1, %vm62_vm0  ;;  %vm71_vm4 = vweird.f32 %v54_v9 }
  0x8e   :  { %v57_v12 = vmul.f32 %v110_v8, %v56_v10 }
  0x90   :  { %v58_v13 = vmul.f32 0.5, %v57_v12 }
  0x92   :  { %v59_v15 = vsub.f32 1.5, %v58_v13 }
  0x93   :  { %v112_v16 = vpop.eup %111 }
  0x94   :  { %v60_v17 = vmul.f32 %v110_v8, %v59_v15  ;;  %v66_v18 = vmul.f32 %v112_v16, %v54_v9  ;;  %vm72_vm3 = vweird.f32 %v112_v16 }
  0x95   :  { %vm73_vm5 = vmor %vm71_vm4, %vm72_vm3 }
  0x96   :  { %v64_v20 = vsel %vm63_vm2, %v110_v8, %v60_v17  ;;  %v67_v21 = vmul.f32 %v112_v16, %v66_v18 }
  0x97   :  { %v75_v22 = vmul.f32 %v64_v20, %v45_v0 }
  0x98   :  { %v68_v23 = vmul.f32 0.5, %v67_v21 }
  0x99   :  { %v80_v24 = vmul.f32 %v78_v19, %v75_v22 }
  0x9a   :  { %v69_v25 = vsub.f32 1.5, %v68_v23 }
  0x9b   :  { %82 = vst [vmem:[#allocation7] sm:$0xff] %v80_v24 }
  0x9c   :  { %v70_v26 = vmul.f32 %v112_v16, %v69_v25 }
  0x9e   :  { %v74_v27 = vsel %vm73_vm5, %v112_v16, %v70_v26 }
  0x9f   :  { %v76_v28 = vmul.f32 %v74_v27, %v46_v2 }
  0xa1   :  { %v81_v29 = vmul.f32 %v78_v19, %v76_v28 }
  0xa3   :  { %83 = vst [vmem:[#allocation7 + $0x8] sm:$0xff] %v81_v29 }
  0xa4   :  { %96 = dma.vmem_to_hbm [thread:$0]  %s89_s1, 256, %s91_s23, [#allocation4], %s192_s17, %s192_s17, %s193_s18  }
  0xa5   :  { %189 = dma.done.wait [#allocation4], 256  }
  0xa6   :  { %190 = vsyncadd [#allocation4], 4294967040 }
  0xa7   :  { %101 = vsyncpa [#allocation3], 1 }
  0xa8   :  { %102 = vsyncpa [#allocation6], 1 }
  0xa9   :  { %103 = vsyncpa [#allocation4], 1 }

</bundles_post_ra>
